<compile_context>
chip_gen: v5e
topology: v5e:2x2
jax: 0.10.0
libtpu: 0.0.40
codegen_flags: <defaults>
</compile_context>

<pallas_src>
import functools

import jax
import jax.numpy as jnp
import numpy as np
from jax import lax
from jax.experimental import pallas as pl
from jax.experimental.pallas import tpu as pltpu

FILTER_SIZES = (2, 3, 4)
NUM_FILTERS = len(FILTER_SIZES)          # 3
NUM_SHIFTS = max(FILTER_SIZES)           # 4
_LANE = 128
_NEG = -1e30                             # finite mask value (avoids 0 * -inf = NaN)


def _round_up(a, b):
    return -(-a // b) * b


def _textcnn_kernel(x_ref, wcat_ref, wfc_ref, bfc_ref, o_ref, *,
                    seq_len, chunk_n):
    """One batch tile of the TextCNN forward.

    x_ref    : (tile_n * L, E)   bf16/f32   embeddings, row r = (n, t)
    wcat_ref : (E, 4 * 3)        bf16/f32   tap i of filter ci in column 3*i+ci
                                            (zero column when i >= filter size)
    wfc_ref  : (3, out_dim)      f32        fc weight (torch fc_w transposed)
    bfc_ref  : (1, out_dim)      f32        fc bias with conv biases folded in
    o_ref    : (tile_n, out_dim) f32
    """
    tile_rows, _ = x_ref.shape
    tile_n = tile_rows // seq_len
    chunk_rows = chunk_n * seq_len
    n_chunks = tile_n // chunk_n

    wcat = wcat_ref[...]
    wfc = wfc_ref[...]
    bfc = bfc_ref[...]

    def process(c):
        r0 = c * chunk_rows
        o0 = c * chunk_n
        if n_chunks > 1:                 # dynamic chunk index -> alignment hints
            r0 = pl.multiple_of(r0, 8)
            o0 = pl.multiple_of(o0, 8)

        xf = x_ref[pl.ds(r0, chunk_rows), :]                       # (rows, E)
        # One MXU pass per chunk: every tap of every filter at once.
        y = jnp.dot(xf, wcat,
                    preferred_element_type=jnp.float32)            # (rows, 12)

        # Shift-and-add on the tiny (rows, 3) responses:
        #   conv[ci][r = n*L + t] = sum_i y[r + i, 3*i + ci]
        # jnp.roll wrap-around only lands at positions t >= L-k_ci+1, which are
        # masked below, so it never contaminates a valid output position.
        acc = y[:, 0:NUM_FILTERS]
        for i in range(1, NUM_SHIFTS):
            acc = acc + jnp.roll(
                y[:, i * NUM_FILTERS:(i + 1) * NUM_FILTERS], -i, axis=0)

        acc3 = acc.reshape(chunk_n, seq_len, NUM_FILTERS)
        # Valid conv positions: t < L - k_ci + 1 with k_ci = 2 + ci.
        t_idx = lax.broadcasted_iota(jnp.int32, acc3.shape, 1)
        f_idx = lax.broadcasted_iota(jnp.int32, acc3.shape, 2)
        masked = jnp.where(t_idx < (seq_len - 1) - f_idx, acc3, _NEG)
        pooled = jnp.max(masked, axis=1)                           # (chunk_n, 3)

        # Exact-f32 VPU rank-1 fc update (tiny: 1/L of the per-row work).
        out = bfc
        for ci in range(NUM_FILTERS):
            out = out + pooled[:, ci:ci + 1] * wfc[ci:ci + 1, :]

        # NOTE: rows are fully independent, so garbage rows in a ragged last
        # batch tile produce garbage outputs that Pallas never copies back.
        o_ref[pl.ds(o0, chunk_n), :] = out

    if n_chunks == 1:
        process(0)
    else:
        def body(c, carry):
            process(c)
            return carry
        lax.fori_loop(0, n_chunks, body, 0)


def _vmem_limit_bytes():
    """Safe on v7x (64 MiB physical VMEM); larger when v5e/v6e is detected."""
    default = 48 * 1024 * 1024
    try:
        cap = int(getattr(pltpu.get_tpu_info(), "vmem_capacity_bytes"))
    except Exception:
        return default
    if cap >= 128 * 1024 * 1024:
        return 80 * 1024 * 1024
    return min(default, (cap * 3) // 4)


def _choose_tiles(n, seq_len, embed_dim, x_itemsize, out_dim, vmem_limit):
    """Tile/chunk sizes from the *padded* VMEM footprint.

    Per batch row (double-buffered, lane-padded):
        x:   2 * L * round_up(E, 128) * itemsize
        out: 2 * round_up(out_dim, 128) * 4
    The f32 chunk intermediates are bounded separately via chunk_n.
    """
    if n < 8:                                   # degenerate tiny batch
        return n, n
    budget = (vmem_limit * 5) // 8              # headroom for chunk temps
    per_row = (2 * seq_len * _round_up(embed_dim, _LANE) * x_itemsize
               + 2 * _round_up(out_dim, _LANE) * 4)
    tile_mem = max(8, (budget // per_row) // 8 * 8)
    # Keep >= ~4 grid steps when N permits: DMA/compute overlap on every
    # generation and dual-TC sharding via dimension_semantics on v7x.
    tile_pipe = _round_up(max(8, -(-n // 4)), 8)
    tile_n = min(tile_mem, tile_pipe)
    # Bound the lane-padded f32 intermediate (y is (chunk_n*L, 128) f32) ~1 MiB.
    chunk_cap = max(8, (((1 << 20) // (seq_len * _LANE * 4)) // 8) * 8)
    chunk_n = min(tile_n, chunk_cap)
    tile_n = max(chunk_n, (tile_n // chunk_n) * chunk_n)
    return tile_n, chunk_n


def textcnn_forward(x_nchw, conv_ws, conv_bs, fc_w, fc_b, *,
                    compute_dtype=jnp.bfloat16, tile_n=None, chunk_n=None):
    """x_nchw: (N, 1, L, E); conv_ws[i]: (1, 1, k_i, E); conv_bs[i]: (1,);
    fc_w: (out_dim, 3) (torch layout); fc_b: (out_dim,)."""
    N, C, L, E = x_nchw.shape
    assert C == 1 and L >= max(FILTER_SIZES)
    out_dim = fc_w.shape[0]

    x2 = x_nchw.reshape(N * L, E).astype(compute_dtype)

    # Taps packed by shift offset: column 3*i + ci = tap i of filter ci,
    # zero column when the filter has fewer than i+1 taps.
    cols = []
    for i in range(NUM_SHIFTS):
        for ci, k in enumerate(FILTER_SIZES):
            if i < k:
                cols.append(conv_ws[ci].reshape(k, E)[i].astype(jnp.float32))
            else:
                cols.append(jnp.zeros((E,), jnp.float32))
    wcat = jnp.stack(cols, axis=1).astype(compute_dtype)            # (E, 12)

    wfc = fc_w.T.astype(jnp.float32)                                 # (3, out_dim)
    bconv = jnp.stack([b.reshape(()) for b in conv_bs]).astype(jnp.float32)
    # Conv biases commute with the max-pool (constant shift), so fold them
    # through the fc:  out = sum_k max_t(raw_k)*wfc_k + (fc_b + sum_k b_k*wfc_k)
    bfc_eff = (fc_b.astype(jnp.float32)
               + jnp.sum(bconv[:, None] * wfc, axis=0)).reshape(1, out_dim)

    vmem_limit = _vmem_limit_bytes()
    auto_tile, auto_chunk = _choose_tiles(
        N, L, E, jnp.dtype(compute_dtype).itemsize, out_dim, vmem_limit)
    if tile_n is None:
        tile_n = auto_tile
    if chunk_n is None:
        chunk_n = min(auto_chunk, tile_n)
    assert chunk_n >= 1 and tile_n % chunk_n == 0
    assert (tile_n % 8 == 0) or (tile_n == N)
    assert (chunk_n % 8 == 0) or (chunk_n == N)

    grid = (pl.cdiv(N, tile_n),)
    kernel = functools.partial(_textcnn_kernel, seq_len=L, chunk_n=chunk_n)

    return pl.pallas_call(
        kernel,
        out_shape=jax.ShapeDtypeStruct((N, out_dim), jnp.float32),
        grid=grid,
        in_specs=[
            pl.BlockSpec((tile_n * L, E), lambda i: (i, 0)),              # x rows
            pl.BlockSpec((E, NUM_SHIFTS * NUM_FILTERS), lambda i: (0, 0)),  # wcat
            pl.BlockSpec((NUM_FILTERS, out_dim), lambda i: (0, 0)),         # wfc
            pl.BlockSpec((1, out_dim), lambda i: (0, 0)),                   # bias
        ],
        out_specs=pl.BlockSpec((tile_n, out_dim), lambda i: (i, 0)),
        compiler_params=pltpu.CompilerParams(
            dimension_semantics=("parallel",),
            vmem_limit_bytes=vmem_limit,
        ),
    )(x2, wcat, wfc, bfc_eff)


def textcnn_reference(x_nchw, conv_ws, conv_bs, fc_w, fc_b, *,
                      compute_dtype=jnp.bfloat16):
    """Pure-JAX reference of the same (intended) semantics.  Conv inputs and
    weights are quantized to `compute_dtype` like the kernel's MXU inputs;
    all accumulation is f32."""
    N, _, L, E = x_nchw.shape
    x3 = x_nchw.reshape(N, L, E).astype(compute_dtype).astype(jnp.float32)
    feats = []
    for k, w, b in zip(FILTER_SIZES, conv_ws, conv_bs):
        wk = w.reshape(k, E).astype(compute_dtype).astype(jnp.float32)
        T = L - k + 1
        acc = jnp.zeros((N, T), jnp.float32)
        for i in range(k):
            acc = acc + jnp.einsum("nte,e->nt", x3[:, i:i + T, :], wk[i],
                                   precision=jax.lax.Precision.HIGHEST)
        feats.append(jnp.max(acc + b.reshape(()), axis=1))
    feat = jnp.stack(feats, axis=1)                                   # (N, 3)
    wfc = fc_w.T.astype(jnp.float32)                                  # (3, out_dim)
    return (fc_b.astype(jnp.float32)[None, :]
            + jnp.sum(feat[:, :, None] * wfc[None, :, :], axis=1))


if __name__ == "__main__":
    # Small shapes consistent with the module: embed_dim=32, out_dim=8,
    # batch N=32 (the auto path then runs a 4-step pipelined grid), L=16.
    N, L, E, OUT = 32, 16, 32, 8

    key = jax.random.PRNGKey(0)
    keys = jax.random.split(key, 9)

    x = jax.random.normal(keys[0], (N, 1, L, E), dtype=jnp.float32)
    conv_ws = [0.1 * jax.random.normal(keys[1 + i], (1, 1, k, E), dtype=jnp.float32)
               for i, k in enumerate(FILTER_SIZES)]
    conv_bs = [0.1 * jax.random.normal(keys[4 + i], (1,), dtype=jnp.float32)
               for i in range(NUM_FILTERS)]
    fc_w = 0.1 * jax.random.normal(keys[7], (OUT, NUM_FILTERS), dtype=jnp.float32)
    fc_b = 0.1 * jax.random.normal(keys[8], (OUT,), dtype=jnp.float32)

    ref32 = jax.block_until_ready(
        textcnn_reference(x, conv_ws, conv_bs, fc_w, fc_b,
                          compute_dtype=jnp.float32))

    # 1) f32 path (torch-f32 parity), auto tiling: grid=(4,), 1 chunk/tile.
    #    Tolerance covers possible multi-pass rounding of f32 MXU matmuls.
    out32 = jax.block_until_ready(
        textcnn_forward(x, conv_ws, conv_bs, fc_w, fc_b,
                        compute_dtype=jnp.float32))
    np.testing.assert_allclose(np.asarray(out32), np.asarray(ref32),
                               rtol=2e-3, atol=2e-3)

    # 2) Same data, forced multi-tile + multi-chunk path: grid=(2,), 2 chunks.
    out_mc = jax.block_until_ready(
        textcnn_forward(x, conv_ws, conv_bs, fc_w, fc_b,
                        compute_dtype=jnp.float32, tile_n=16, chunk_n=8))
    np.testing.assert_allclose(np.asarray(out_mc), np.asarray(ref32),
                               rtol=2e-3, atol=2e-3)

    # 3) Default bf16 MXU-input path vs a bf16-quantized reference (tight:
    #    bf16 products are exact in the f32 accumulator on both sides).
    out_bf = jax.block_until_ready(
        textcnn_forward(x, conv_ws, conv_bs, fc_w, fc_b,
                        compute_dtype=jnp.bfloat16))
    ref_bf = jax.block_until_ready(
        textcnn_reference(x, conv_ws, conv_bs, fc_w, fc_b,
                          compute_dtype=jnp.bfloat16))
    np.testing.assert_allclose(np.asarray(out_bf), np.asarray(ref_bf),
                               rtol=1e-4, atol=1e-4)

    print("KERNEL_OK")
</pallas_src>

<mosaic_0001>
module attributes {stable_mosaic.version = 11 : i64} {
  func.func @_textcnn_kernel(%arg0: i32, %arg1: memref<128x32xf32, #tpu.memory_space<vmem>>, %arg2: memref<32x12xf32, #tpu.memory_space<vmem>>, %arg3: memref<3x8xf32, #tpu.memory_space<vmem>>, %arg4: memref<1x8xf32, #tpu.memory_space<vmem>>, %arg5: memref<8x8xf32, #tpu.memory_space<vmem>>) attributes {dimension_semantics = [#tpu.dimension_semantics<parallel>], iteration_bounds = array<i64: 4>, scalar_prefetch = 0 : i64, scratch_operands = 0 : i64, tpu.core_type = #tpu.core_type<tc>, window_params = [{transform_indices = @transform_0, window_bounds = array<i64: 128, 32>}, {pipeline_mode = #tpu.pipeline_mode<synchronous>, transform_indices = @transform_1, window_bounds = array<i64: 32, 12>}, {pipeline_mode = #tpu.pipeline_mode<synchronous>, transform_indices = @transform_2, window_bounds = array<i64: 3, 8>}, {pipeline_mode = #tpu.pipeline_mode<synchronous>, transform_indices = @transform_3, window_bounds = array<i64: 1, 8>}, {transform_indices = @transform_4, window_bounds = array<i64: 8, 8>}]} {
    %c0 = arith.constant 0 : index
    %c0_0 = arith.constant 0 : index
    %0 = vector.load %arg2[%c0, %c0_0] : memref<32x12xf32, #tpu.memory_space<vmem>>, vector<32x12xf32>
    %c0_1 = arith.constant 0 : index
    %c0_2 = arith.constant 0 : index
    %1 = vector.load %arg3[%c0_1, %c0_2] : memref<3x8xf32, #tpu.memory_space<vmem>>, vector<3x8xf32>
    %c0_3 = arith.constant 0 : index
    %c0_4 = arith.constant 0 : index
    %2 = vector.load %arg4[%c0_3, %c0_4] : memref<1x8xf32, #tpu.memory_space<vmem>>, vector<1x8xf32>
    %c0_5 = arith.constant 0 : index
    %c0_6 = arith.constant 0 : index
    %3 = vector.load %arg1[%c0_5, %c0_6] : memref<128x32xf32, #tpu.memory_space<vmem>>, vector<128x32xf32>
    %cst = arith.constant dense<0.000000e+00> : vector<128x12xf32>
    %4 = tpu.matmul %3, %0, %cst {dimension_numbers = #tpu.dot_dimension_numbers<[1], [0], [0], [1], [0, 0, 1, 1], [], []>} : vector<128x32xf32>, vector<32x12xf32>, vector<128x12xf32> -> vector<128x12xf32>
    %5 = vector.extract_strided_slice %4 {offsets = [0, 0], sizes = [128, 3], strides = [1, 1]} : vector<128x12xf32> to vector<128x3xf32>
    %6 = vector.extract_strided_slice %4 {offsets = [0, 3], sizes = [128, 3], strides = [1, 1]} : vector<128x12xf32> to vector<128x3xf32>
    %7 = vector.extract_strided_slice %6 {offsets = [1, 0], sizes = [127, 3], strides = [1, 1]} : vector<128x3xf32> to vector<127x3xf32>
    %8 = vector.extract_strided_slice %6 {offsets = [0, 0], sizes = [1, 3], strides = [1, 1]} : vector<128x3xf32> to vector<1x3xf32>
    %9 = tpu.concatenate %7, %8 in 0 : vector<127x3xf32>, vector<1x3xf32> -> vector<128x3xf32>
    %10 = arith.addf %5, %9 : vector<128x3xf32>
    %11 = vector.extract_strided_slice %4 {offsets = [0, 6], sizes = [128, 3], strides = [1, 1]} : vector<128x12xf32> to vector<128x3xf32>
    %12 = vector.extract_strided_slice %11 {offsets = [2, 0], sizes = [126, 3], strides = [1, 1]} : vector<128x3xf32> to vector<126x3xf32>
    %13 = vector.extract_strided_slice %11 {offsets = [0, 0], sizes = [2, 3], strides = [1, 1]} : vector<128x3xf32> to vector<2x3xf32>
    %14 = tpu.concatenate %12, %13 in 0 : vector<126x3xf32>, vector<2x3xf32> -> vector<128x3xf32>
    %15 = arith.addf %10, %14 : vector<128x3xf32>
    %16 = vector.extract_strided_slice %4 {offsets = [0, 9], sizes = [128, 3], strides = [1, 1]} : vector<128x12xf32> to vector<128x3xf32>
    %17 = vector.extract_strided_slice %16 {offsets = [3, 0], sizes = [125, 3], strides = [1, 1]} : vector<128x3xf32> to vector<125x3xf32>
    %18 = vector.extract_strided_slice %16 {offsets = [0, 0], sizes = [3, 3], strides = [1, 1]} : vector<128x3xf32> to vector<3x3xf32>
    %19 = tpu.concatenate %17, %18 in 0 : vector<125x3xf32>, vector<3x3xf32> -> vector<128x3xf32>
    %20 = arith.addf %15, %19 : vector<128x3xf32>
    %21 = vector.shape_cast %20 : vector<128x3xf32> to vector<8x16x3xf32>
    %22 = tpu.iota {dimensions = array<i32: 1>} : vector<8x16x3xi32>
    %23 = tpu.iota {dimensions = array<i32: 2>} : vector<8x16x3xi32>
    %c15_i32 = arith.constant 15 : i32
    %24 = vector.broadcast %c15_i32 : i32 to vector<8x16x3xi32>
    %25 = arith.subi %24, %23 : vector<8x16x3xi32>
    %26 = arith.cmpi slt, %22, %25 : vector<8x16x3xi32>
    %cst_7 = arith.constant -1.000000e+30 : f32
    %27 = vector.broadcast %cst_7 : f32 to vector<8x16x3xf32>
    %28 = arith.select %26, %21, %27 : vector<8x16x3xi1>, vector<8x16x3xf32>
    %cst_8 = arith.constant dense<0xFF800000> : vector<8x3xf32>
    %29 = vector.multi_reduction <maximumf>, %28, %cst_8 [1] : vector<8x16x3xf32> to vector<8x3xf32>
    %30 = vector.extract_strided_slice %29 {offsets = [0, 0], sizes = [8, 1], strides = [1, 1]} : vector<8x3xf32> to vector<8x1xf32>
    %31 = vector.extract_strided_slice %1 {offsets = [0, 0], sizes = [1, 8], strides = [1, 1]} : vector<3x8xf32> to vector<1x8xf32>
    %32 = vector.broadcast %30 : vector<8x1xf32> to vector<8x8xf32>
    %33 = vector.broadcast %31 : vector<1x8xf32> to vector<8x8xf32>
    %34 = arith.mulf %32, %33 : vector<8x8xf32>
    %35 = vector.broadcast %2 : vector<1x8xf32> to vector<8x8xf32>
    %36 = arith.addf %35, %34 : vector<8x8xf32>
    %37 = vector.extract_strided_slice %29 {offsets = [0, 1], sizes = [8, 1], strides = [1, 1]} : vector<8x3xf32> to vector<8x1xf32>
    %38 = vector.extract_strided_slice %1 {offsets = [1, 0], sizes = [1, 8], strides = [1, 1]} : vector<3x8xf32> to vector<1x8xf32>
    %39 = vector.broadcast %37 : vector<8x1xf32> to vector<8x8xf32>
    %40 = vector.broadcast %38 : vector<1x8xf32> to vector<8x8xf32>
    %41 = arith.mulf %39, %40 : vector<8x8xf32>
    %42 = arith.addf %36, %41 : vector<8x8xf32>
    %43 = vector.extract_strided_slice %29 {offsets = [0, 2], sizes = [8, 1], strides = [1, 1]} : vector<8x3xf32> to vector<8x1xf32>
    %44 = vector.extract_strided_slice %1 {offsets = [2, 0], sizes = [1, 8], strides = [1, 1]} : vector<3x8xf32> to vector<1x8xf32>
    %45 = vector.broadcast %43 : vector<8x1xf32> to vector<8x8xf32>
    %46 = vector.broadcast %44 : vector<1x8xf32> to vector<8x8xf32>
    %47 = arith.mulf %45, %46 : vector<8x8xf32>
    %48 = arith.addf %42, %47 : vector<8x8xf32>
    %c0_9 = arith.constant 0 : index
    %c0_10 = arith.constant 0 : index
    %49 = vector.load %arg5[%c0_9, %c0_10] : memref<8x8xf32, #tpu.memory_space<vmem>>, vector<8x8xf32>
    tpu.vector_store %arg5[%c0_9, %c0_10], %48 {strides = array<i32>} : memref<8x8xf32, #tpu.memory_space<vmem>>, vector<8x8xf32>,
    return
  }
  func.func @transform_0(%arg0: i32) -> (i32, i32) {
    %c0_i32 = arith.constant 0 : i32
    %c0_i32_0 = arith.constant 0 : i32
    return %arg0, %c0_i32 : i32, i32
  }
  func.func @transform_1(%arg0: i32) -> (i32, i32) {
    %c0_i32 = arith.constant 0 : i32
    %c0_i32_0 = arith.constant 0 : i32
    %c0_i32_1 = arith.constant 0 : i32
    return %c0_i32, %c0_i32_0 : i32, i32
  }
  func.func @transform_2(%arg0: i32) -> (i32, i32) {
    %c0_i32 = arith.constant 0 : i32
    %c0_i32_0 = arith.constant 0 : i32
    %c0_i32_1 = arith.constant 0 : i32
    return %c0_i32, %c0_i32_0 : i32, i32
  }
  func.func @transform_3(%arg0: i32) -> (i32, i32) {
    %c0_i32 = arith.constant 0 : i32
    %c0_i32_0 = arith.constant 0 : i32
    %c0_i32_1 = arith.constant 0 : i32
    return %c0_i32, %c0_i32_0 : i32, i32
  }
  func.func @transform_4(%arg0: i32) -> (i32, i32) {
    %c0_i32 = arith.constant 0 : i32
    %c0_i32_0 = arith.constant 0 : i32
    return %arg0, %c0_i32 : i32, i32
  }
}

</mosaic_0001>

<bundles_post_ra>
// kernel: tpu_custom_call.1
= control target key start
LH: loop header
LB: loop body
LE: loop exit
PB: predicated region body
PF: predicated region fallthrough
CT: control target
= control target key end

     0   :  { %s1128_s15 = smov 0   ;;  %s1629_s0 = inlined_call_operand.vmem [shape: f32[512,32], index: 0, kind: input, shape index: {}]   ;;  %s1630_s1 = inlined_call_operand.vmem [shape: f32[32,12], index: 1, kind: input, shape index: {}]   ;;  %s1631_s2 = inlined_call_operand.vmem [shape: f32[3,8], index: 2, kind: input, shape index: {}]   ;;  %s1632_s3 = inlined_call_operand.vmem [shape: f32[1,8], index: 3, kind: input, shape index: {}]   ;;  %s1633_s4 = inlined_call_operand.vmem [shape: f32[32,8], index: 4, kind: output, shape index: {}]  }
   0x1 LB: > { %s1134_s16 = sadd.s32 4294967295, %s1095_s15   ;;  %p1019_p0 = scmp.ge.s32.totalorder %s1095_s15, 1  ;;  %s1095_s15 = sphi %s1128_s15, %s14_s15  }
   0x2   : > { %p163_p1 = scmp.lt.s32.totalorder %s1095_s15, 5 }
   0x4   : > { %p164_p2 = pnand %p1019_p0, %p163_p1 }
   0x5   : > { %s1020_s21 = sshll.u32 (!%p164_p2), %s1134_s16, 4  ;;  %s1097_s30 = smov (!%p164_p2), 125  }
   0x6   : > { %167 = sbr.rel (%p164_p2) target bundleno = 554 (0x22a), region = 36  ;;  %p189_p3 = scmp.lt.s32.totalorder (!%p164_p2), %s1020_s21, 63 }
   0x7   : > { %s1098_s5 = smov (!%p164_p2), 122   ;;  %s1099_s6 = smov (!%p164_p2), 119  }
   0x8   : > { %p194_p4 = scmp.lt.s32.totalorder (!%p164_p2), %s1134_s16, 3 }
   0xb   : > { %v201_v0 = vld [vmem:[%s1630_s1 + $0x18] sm:$0xff]  ;;  %v200_v1 = vld [vmem:[%s1630_s1 + $0x10] sm:$0xff]  ;;  %v199_v2 = vld [vmem:[%s1630_s1 + $0x8] sm:$0xff]  ;;  %s1639_s21 = smov (!%p189_p3, %s1020_s21), 63  ;;  %vm220_vm0 = vcmask 261120   ;;  %vm350_vm1 = vcmask 1046528  }
   0xc   : > { %281 = vmatpush.msra.mxu0 %v201_v0  ;;  %1041 = vmatpush.msra.mxu1 %v201_v0  ;;  %v198_v3 = vld [vmem:[%s1630_s1] sm:$0xff]  ;;  %s1021_s26 = sshll.u32 %s1639_s21, 3  ;;  %vm450_vm2 = vcmask 1045504   ;;  %vm550_vm3 = vcmask 1044480   ;;  %vm674_vm6 = vcmask 23552   ;;  %vm808_vm7 = vcmask 1041409  }
   0xd   : > { %1042 = vmatpush.msra.mxu2 %v201_v0  ;;  %1043 = vmatpush.msra.mxu3 %v201_v0  ;;  %s1154_s29 = scalar_lea.vmem %s1629_s0, %s1021_s26  ;;  %vm811_vm8 = vcmask 1042434   ;;  %vm814_vm9 = vcmask 1043459   ;;  %vm817_vm10 = vcmask 1044484   ;;  %vm820_vm11 = vcmask 1045509   ;;  %s1641_s16 = smov (!%p194_p4, %s1134_s16), 3 }
   0xe   : > { %282 = vmatpush.msra.mxu0 %v200_v1  ;;  %1044 = vmatpush.msra.mxu1 %v200_v1  ;;  %v204_v4 = vld [vmem:[%s1154_s29] sm:$0xff]  ;;  %v205_v8 = vld [vmem:[%s1154_s29 + $0x8] sm:$0xff]  ;;  %v206_v12 = vld [vmem:[%s1154_s29 + $0x10] sm:$0xff]  ;;  %vm823_vm12 = vcmask 1046534   ;;  %vm826_vm13 = vcmask 1047559   ;;  %s1022_s11 = sshll.u32 %s1641_s16, 3 }
   0xf   : > { %1045 = vmatpush.msra.mxu2 %v200_v1  ;;  %1046 = vmatpush.msra.mxu3 %v200_v1  ;;  %v208_v5 = vld [vmem:[%s1154_s29 + $0x20] sm:$0xff]  ;;  %v209_v9 = vld [vmem:[%s1154_s29 + $0x28] sm:$0xff]  ;;  %v210_v13 = vld [vmem:[%s1154_s29 + $0x30] sm:$0xff]  ;;  %s197_s14 = scalar_lea.vmem %s1633_s4, %s1022_s11  ;;  %vm960_vm14 = vcmask 64512  }
  0x10   : > { %283 = vmatpush.msra.mxu0 %v199_v2  ;;  %1047 = vmatpush.msra.mxu1 %v199_v2  ;;  %v212_v6 = vld [vmem:[%s1154_s29 + $0x40] sm:$0xff]  ;;  %v213_v10 = vld [vmem:[%s1154_s29 + $0x48] sm:$0xff]  ;;  %v214_v14 = vld [vmem:[%s1154_s29 + $0x50] sm:$0xff] }
  0x11   : > { %1048 = vmatpush.msra.mxu2 %v199_v2  ;;  %1049 = vmatpush.msra.mxu3 %v199_v2  ;;  %v216_v7 = vld [vmem:[%s1154_s29 + $0x60] sm:$0xff]  ;;  %v217_v11 = vld [vmem:[%s1154_s29 + $0x68] sm:$0xff]  ;;  %v218_v15 = vld [vmem:[%s1154_s29 + $0x70] sm:$0xff] }
  0x12   : > { %284 = vmatpush.msra.mxu0 %v198_v3  ;;  %1050 = vmatpush.msra.mxu1 %v198_v3  ;;  %v207_v16 = vld [vmem:[%s1154_s29 + $0x18] sm:$0xff] }
  0x13   : > { %1051 = vmatpush.msra.mxu2 %v198_v3  ;;  %1052 = vmatpush.msra.mxu3 %v198_v3  ;;  %v211_v17 = vld [vmem:[%s1154_s29 + $0x38] sm:$0xff] }
  0x14   : > { %1023 = vmatmul.msk.f32.vlgmr.msra.gmra.mxu0 %vm220_vm0, %v204_v4  ;;  %1027 = vmatmul.msk.f32.vlgmr.msra.gmra.mxu1 %vm220_vm0, %v208_v5  ;;  %v215_v18 = vld [vmem:[%s1154_s29 + $0x58] sm:$0xff] }
  0x15   : > { %1031 = vmatmul.msk.f32.vlgmr.msra.gmra.mxu2 %vm220_vm0, %v212_v6  ;;  %1035 = vmatmul.msk.f32.vlgmr.msra.gmra.mxu3 %vm220_vm0, %v216_v7  ;;  %v219_v19 = vld [vmem:[%s1154_s29 + $0x78] sm:$0xff] }
  0x1c   : > { %1024 = vmatmul.msk.f32.gmra.mxu0 %vm220_vm0, %v205_v8  ;;  %1028 = vmatmul.msk.f32.gmra.mxu1 %vm220_vm0, %v209_v9 }
  0x1d   : > { %1032 = vmatmul.msk.f32.gmra.mxu2 %vm220_vm0, %v213_v10  ;;  %1036 = vmatmul.msk.f32.gmra.mxu3 %vm220_vm0, %v217_v11 }
  0x24   : > { %1025 = vmatmul.msk.f32.gmra.mxu0 %vm220_vm0, %v206_v12  ;;  %1029 = vmatmul.msk.f32.gmra.mxu1 %vm220_vm0, %v210_v13 }
  0x25   : > { %1033 = vmatmul.msk.f32.gmra.mxu2 %vm220_vm0, %v214_v14  ;;  %1037 = vmatmul.msk.f32.gmra.mxu3 %vm220_vm0, %v218_v15 }
  0x2c   : > { %1026 = vmatmul.msk.f32.gmra.mxu0 %vm220_vm0, %v207_v16  ;;  %1030 = vmatmul.msk.f32.gmra.mxu1 %vm220_vm0, %v211_v17 }
  0x2d   : > { %1034 = vmatmul.msk.f32.gmra.mxu2 %vm220_vm0, %v215_v18  ;;  %1038 = vmatmul.msk.f32.gmra.mxu3 %vm220_vm0, %v219_v19 }
  0x91   : > { %v1188_v20 = vpop.f32.mrf.mxu0  ;;  %v1190_v21 = vpop.f32.mrf.mxu1 }
  0x92   : > { %v358_v26 = vrot.slane %v1190_v21, 1  ;;  %v451_v27 = vrot.slane %v1188_v20, 2  ;;  %v351_v30 = vrot.slane %v1188_v20, 1  ;;  %v458_v38 = vrot.slane %v1190_v21, 2 }
  0x93   : > { %v558_v42 = vrot.slane %v1190_v21, 3  ;;  %v551_v57 = vrot.slane %v1188_v20, 3 }
  0x98   : > { %v1192_v22 = vpop.f32.mrf.mxu2  ;;  %v1194_v23 = vpop.f32.mrf.mxu3 }
  0x99   : > { %v1196_v24 = vpop.f32.mrf.mxu0  ;;  %v1198_v25 = vpop.f32.mrf.mxu1  ;;  %v474_v35 = vrot.slane %v1194_v23, 2  ;;  %v566_v48 = vrot.slane %v1192_v22, 3  ;;  %v374_v55 = vrot.slane %v1194_v23, 1  ;;  %v366_v1 = vrot.slane %v1192_v22, 1 }
  0x9a   : > { %v360_v28 = vrot.slane %v1198_v25, 1  ;;  %v452_v29 = vrot.slane %v1196_v24, 2  ;;  %v352_v31 = vrot.slane %v1196_v24, 1  ;;  %v460_v39 = vrot.slane %v1198_v25, 2 }
  0x9b   : > { %v560_v43 = vrot.slane %v1198_v25, 3  ;;  %v552_v52 = vrot.slane %v1196_v24, 3  ;;  %v466_v2 = vrot.slane %v1192_v22, 2  ;;  %v574_v19 = vrot.slane %v1194_v23, 3 }
  0x9c   : > { %v361_v32 = vsel %vm350_vm1, %v358_v26, %v360_v28  ;;  %v453_v33 = vsel %vm450_vm2, %v451_v27, %v452_v29  ;;  %v353_v34 = vsel %vm350_vm1, %v351_v30, %v352_v31  ;;  %v461_v46 = vsel %vm450_vm2, %v458_v38, %v460_v39 }
  0x9d   : > { %394 = vrot.lane.b32.xlu2 %v361_v32, %s1097_s30  ;;  %486 = vrot.lane.b32.xlu1 %v453_v33, %s1098_s5  ;;  %v561_v47 = vsel %vm550_vm3, %v558_v42, %v560_v43  ;;  %v553_v62 = vsel %vm550_vm3, %v551_v57, %v552_v52 }
  0x9e   : > { %386 = vrot.lane.b32.xlu0 %v353_v34, %s1097_s30 }
  0xa0   : > { %v1225_v36 = vpop.f32.mrf.mxu2  ;;  %v1227_v37 = vpop.f32.mrf.mxu3 }
  0xa1   : > { %v1231_v40 = vpop.f32.mrf.mxu0  ;;  %v1233_v41 = vpop.f32.mrf.mxu1  ;;  %v476_v44 = vrot.slane %v1227_v37, 2  ;;  %v568_v49 = vrot.slane %v1225_v36, 3  ;;  %v376_v56 = vrot.slane %v1227_v37, 1  ;;  %v368_v5 = vrot.slane %v1225_v36, 1 }
  0xa2   : > { %v562_v63 = vrot.slane %v1233_v41, 3  ;;  %v468_v15 = vrot.slane %v1225_v36, 2 }
  0xa3   : > { %v477_v45 = vsel %vm450_vm2, %v474_v35, %v476_v44  ;;  %v569_v60 = vsel %vm550_vm3, %v566_v48, %v568_v49  ;;  %v377_v0 = vsel %vm350_vm1, %v374_v55, %v376_v56 }
  0xa5   : > { %494 = vrot.lane.b32.xlu2 %v461_v46, %s1098_s5  ;;  %510 = vrot.lane.b32.xlu1 %v477_v45, %s1098_s5  ;;  %v563_v46 = vsel %vm550_vm3, %v560_v43, %v562_v63  ;;  %v576_v43 = vrot.slane %v1227_v37, 3 }
  0xa6   : > { %594 = vrot.lane.b32.xlu0 %v561_v47, %s1099_s6 }
  0xa8   : > { %v1250_v50 = vpop.f32.mrf.mxu2  ;;  %v1252_v51 = vpop.f32.mrf.mxu3 }
  0xa9   : > { %v1255_v53 = vpop.f32.mrf.mxu0  ;;  %v1257_v54 = vpop.f32.mrf.mxu1  ;;  %v378_v6 = vrot.slane %v1252_v51, 1  ;;  %v470_v16 = vrot.slane %v1250_v50, 2 }
  0xaa   : > { %v456_v58 = vrot.slane %v1255_v53, 2  ;;  %v556_v59 = vrot.slane %v1255_v53, 3  ;;  %v564_v61 = vrot.slane %v1257_v54, 3 }
  0xac   : > { %v1281_v3 = vsel %vm450_vm2, %v456_v58, %v458_v38  ;;  %v1286_v4 = vsel %vm550_vm3, %v556_v59, %v558_v42  ;;  %v1295_v9 = vsel %vm550_vm3, %v562_v63, %v564_v61  ;;  %v1298_v10 = vsel %vm550_vm3, %v564_v61, %v566_v48 }
  0xad   : > { %586 = vrot.lane.b32.xlu2 %v553_v62, %s1099_s6  ;;  %602 = vrot.lane.b32.xlu1 %v569_v60, %s1099_s6  ;;  %v354_v48 = vrot.slane %v1231_v40, 1  ;;  %v379_v60 = vsel %vm350_vm1, %v376_v56, %v378_v6  ;;  %v362_v61 = vrot.slane %v1233_v41, 1  ;;  %v462_v62 = vrot.slane %v1233_v41, 2 }
  0xae   : > { %410 = vrot.lane.b32.xlu0 %v377_v0, %s1097_s30  ;;  %v471_v56 = vsel %vm450_vm2, %v468_v15, %v470_v16  ;;  %v454_v0 = vrot.slane %v1231_v40, 2 }
  0xaf   : > { %v363_v63 = vsel %vm350_vm1, %v360_v28, %v362_v61 }
  0xb0   : > { %v1290_v7 = vpop.f32.mrf.mxu2  ;;  %v1292_v8 = vpop.f32.mrf.mxu3  ;;  %v455_v28 = vsel %vm450_vm2, %v452_v29, %v454_v0 }
  0xb1   : > { %v372_v11 = vrot.slane %v1290_v7, 1  ;;  %v472_v12 = vrot.slane %v1290_v7, 2  ;;  %v572_v13 = vrot.slane %v1290_v7, 3  ;;  %v380_v14 = vrot.slane %v1292_v8, 1 }
  0xb2   : > { %v480_v17 = vrot.slane %v1292_v8, 2  ;;  %v580_v18 = vrot.slane %v1292_v8, 3 }
  0xb3   : > { %v1312_v32 = vsel %vm350_vm1, %v372_v11, %v374_v55  ;;  %v1317_v33 = vsel %vm350_vm1, %v380_v14, %v351_v30  ;;  %v1320_v34 = vsel %vm350_vm1, %v378_v6, %v380_v14  ;;  %v1323_v38 = vsel %vm450_vm2, %v472_v12, %v474_v35 }
  0xb4   : > { %v1330_v42 = vsel %vm450_vm2, %v480_v17, %v451_v27  ;;  %v1333_v45 = vsel %vm450_vm2, %v470_v16, %v472_v12  ;;  %v369_v30 = vsel %vm350_vm1, %v366_v1, %v368_v5  ;;  %v1342_v35 = vsel %vm550_vm3, %v572_v13, %v574_v19 }
  0xb5   : > { %v1347_v47 = vsel %vm550_vm3, %v580_v18, %v551_v57  ;;  %402 = vrot.lane.b32.xlu2 %v369_v30, %s1097_s30  ;;  %596 = vrot.lane.b32.xlu1 %v563_v46, %s1099_s6  ;;  %v469_v27 = vsel %vm450_vm2, %v466_v2, %v468_v15  ;;  %v577_v55 = vsel %vm550_vm3, %v574_v19, %v576_v43  ;;  %v554_v6 = vrot.slane %v1231_v40, 3 }
  0xb6   : > { %502 = vrot.lane.b32.xlu0 %v469_v27, %s1098_s5  ;;  %v355_v57 = vsel %vm350_vm1, %v352_v31, %v354_v48  ;;  %v463_v31 = vsel %vm450_vm2, %v460_v39, %v462_v62  ;;  %v356_v12 = vrot.slane %v1255_v53, 1  ;;  %v478_v15 = vrot.slane %v1252_v51, 2 }
  0xb7   : > { %v555_v39 = vsel %vm550_vm3, %v552_v52, %v554_v6  ;;  %v370_v16 = vrot.slane %v1250_v50, 1  ;;  %v570_v30 = vrot.slane %v1250_v50, 3  ;;  %v364_v46 = vrot.slane %v1257_v54, 1 }
  0xb8   : > { %v357_v14 = vsel %vm350_vm1, %v354_v48, %v356_v12  ;;  %v479_v29 = vsel %vm450_vm2, %v476_v44, %v478_v15  ;;  %v359_v19 = vsel %vm350_vm1, %v356_v12, %v358_v26  ;;  %v578_v27 = vrot.slane %v1252_v51, 3 }
  0xb9   : > { %v371_v52 = vsel %vm350_vm1, %v368_v5, %v370_v16  ;;  %v571_v44 = vsel %vm550_vm3, %v568_v49, %v570_v30  ;;  %v367_v26 = vsel %vm350_vm1, %v364_v46, %v366_v1  ;;  %v464_v48 = vrot.slane %v1257_v54, 2 }
  0xba   : > { %v579_v5 = vsel %vm550_vm3, %v576_v43, %v578_v27  ;;  %v365_v49 = vsel %vm350_vm1, %v362_v61, %v364_v46  ;;  %v457_v43 = vsel %vm450_vm2, %v454_v0, %v456_v58  ;;  %v373_v58 = vsel %vm350_vm1, %v370_v16, %v372_v11 }
  0xbb   : > { %v465_v1 = vsel %vm450_vm2, %v462_v62, %v464_v48  ;;  %v650_v62 = vlaneseq }
  0xbd   : > { %610 = vrot.lane.b32.xlu2 %v577_v55, %s1099_s6  ;;  %412 = vrot.lane.b32.xlu1 %v379_v60, %s1097_s30  ;;  %v467_v55 = vsel %vm450_vm2, %v464_v48, %v466_v2  ;;  %v557_v2 = vsel %vm550_vm3, %v554_v6, %v556_v59  ;;  %v651_v12 = vshrl.u32 %v650_v62, 7 }
  0xbe   : > { %388 = vrot.lane.b32.xlu0 %v355_v57, %s1097_s30 }
  0xc5   : > { %396 = vrot.lane.b32.xlu2 %v363_v63, %s1097_s30  ;;  %504 = vrot.lane.b32.xlu1 %v471_v56, %s1098_s5  ;;  %v1101_v63 = vmov 0  }
  0xc6   : > { %496 = vrot.lane.b32.xlu0 %v463_v31, %s1098_s5  ;;  %1068 = vset.pattern.permute.xlu2 %v1101_v63  ;;  %v654_v31 = vand.u32 127, %v650_v62 }
  0xc7   : > { %1067 = vset.pattern.permute.xlu0 %v1101_v63 }
  0xcd   : > { %488 = vrot.lane.b32.xlu2 %v455_v28, %s1098_s5  ;;  %390 = vrot.lane.b32.xlu1 %v357_v14, %s1097_s30 }
  0xce   : > { %588 = vrot.lane.b32.xlu0 %v555_v39, %s1099_s6  ;;  %v655_v39 = vsub.s32 15, %v654_v31 }
  0xd0   : > { %vm1480_vm4 = vcmp.lt.s32.totalorder %v651_v12, %v655_v39 }
  0xd5   : > { %512 = vrot.lane.b32.xlu2 %v479_v29, %s1098_s5  ;;  %392 = vrot.lane.b32.xlu1 %v359_v19, %s1097_s30 }
  0xd6   : > { %404 = vrot.lane.b32.xlu0 %v371_v52, %s1097_s30 }
  0xdd   : > { %604 = vrot.lane.b32.xlu2 %v571_v44, %s1099_s6  ;;  %400 = vrot.lane.b32.xlu1 %v367_v26, %s1097_s30 }
  0xde   : > { %612 = vrot.lane.b32.xlu0 %v579_v5, %s1099_s6 }
  0xe5   : > { %500 = vrot.lane.b32.xlu2 %v467_v55, %s1098_s5  ;;  %492 = vrot.lane.b32.xlu1 %v1281_v3, %s1098_s5 }
  0xe6   : > { %398 = vrot.lane.b32.xlu0 %v365_v49, %s1097_s30 }
  0xed   : > { %592 = vrot.lane.b32.xlu2 %v1286_v4, %s1099_s6  ;;  %498 = vrot.lane.b32.xlu1 %v465_v1, %s1098_s5 }
  0xee   : > { %490 = vrot.lane.b32.xlu0 %v457_v43, %s1098_s5 }
  0xf5   : > { %598 = vrot.lane.b32.xlu2 %v1295_v9, %s1099_s6  ;;  %590 = vrot.lane.b32.xlu1 %v557_v2, %s1099_s6  ;;  %v481_v9 = vsel %vm450_vm2, %v478_v15, %v480_v17  ;;  %v652_v15 = vadd.s32 8, %v651_v12 }
  0xf6   : > { %600 = vrot.lane.b32.xlu0 %v1298_v10, %s1099_s6 }
  0xf7   : > { %v395_v3 = vpop.permute.xlu2 %394  ;;  %vm1484_vm5 = vcmp.lt.s32.totalorder %v652_v15, %v655_v39 }
  0xf8   : > { %v438_v0 = vadd.f32 %v395_v3, %v1190_v21 }
  0xfd   : > { %408 = vrot.lane.b32.xlu2 %v1312_v32, %s1097_s30  ;;  %406 = vrot.lane.b32.xlu1 %v373_v58, %s1097_s30 }
  0xfe   : > { %416 = vrot.lane.b32.xlu0 %v1317_v33, %s1097_s30  ;;  %v581_v33 = vsel %vm550_vm3, %v578_v27, %v580_v18 }
  0xff   : > { %v495_v59 = vpop.permute.xlu2 %494 }
 0x100   : > { %v538_v28 = vadd.f32 %v495_v59, %v438_v0 }
 0x105   : > { %414 = vrot.lane.b32.xlu2 %v1320_v34, %s1097_s30  ;;  %516 = vrot.lane.b32.xlu1 %v1330_v42, %s1098_s5  ;;  %v573_v34 = vsel %vm550_vm3, %v570_v30, %v572_v13 }
 0x106   : > { %508 = vrot.lane.b32.xlu0 %v1323_v38, %s1098_s5 }
 0x107   : > { %v587_v4 = vpop.permute.xlu2 %586 }
 0x10d   : > { %506 = vrot.lane.b32.xlu2 %v1333_v45, %s1098_s5  ;;  %608 = vrot.lane.b32.xlu1 %v1342_v35, %s1099_s6 }
 0x10e   : > { %514 = vrot.lane.b32.xlu0 %v481_v9, %s1098_s5 }
 0x10f   : > { %v403_v10 = vpop.permute.xlu2 %402  ;;  %v487_v11 = vpop.permute.xlu1 %486 }
 0x110   : > { %v387_v32 = vpop.permute.xlu0 %386 }
 0x111   : > { %v434_v14 = vadd.f32 %v387_v32, %v1188_v20 }
 0x113   : > { %v534_v30 = vadd.f32 %v487_v11, %v434_v14 }
 0x115   : > { %616 = vrot.lane.b32.xlu2 %v1347_v47, %s1099_s6  ;;  %614 = vrot.lane.b32.xlu1 %v581_v33, %s1099_s6  ;;  %v1100_v47 = vmov 2   ;;  %v634_v5 = vadd.f32 %v587_v4, %v534_v30  ;;  %v442_v4 = vadd.f32 %v403_v10, %v1192_v22 }
 0x116   : > { %606 = vrot.lane.b32.xlu0 %v573_v34, %s1099_s6  ;;  %1071 = vset.pattern.permute.xlu1 %v1100_v47 }
 0x117   : > { %v1472_v17 = vpop.permute.xlu2 %610  ;;  %v511_v38 = vpop.permute.xlu1 %510 }
 0x118   : > { %v595_v42 = vpop.permute.xlu0 %594 }
 0x119   : > { %v638_v16 = vadd.f32 %v595_v42, %v538_v28 }
 0x11b   : > { %v662_v20 = vsel %vm1480_vm4, %v638_v16, -1e+30 }
 0x11c   : > { %v693_v55 = vsel %vm674_vm6, %v662_v20, -inf }
 0x11f   : > { %v397_v45 = vpop.permute.xlu2 %396  ;;  %v603_v35 = vpop.permute.xlu1 %602 }
 0x120   : > { %v411_v60 = vpop.permute.xlu0 %410  ;;  %v439_v29 = vadd.f32 %v397_v45, %v1198_v25 }
 0x121   : > { %v446_v32 = vadd.f32 %v411_v60, %v1194_v23 }
 0x123   : > { %v546_v0 = vadd.f32 %v511_v38, %v446_v32 }
 0x127   : > { %v597_v57 = vpop.permute.xlu1 %596  ;;  %v489_v61 = vpop.permute.xlu2 %488 }
 0x128   : > { %v503_v18 = vpop.permute.xlu0 %502 }
 0x129   : > { %v542_v42 = vadd.f32 %v503_v18, %v442_v4  ;;  %v646_v18 = vadd.f32 %v1472_v17, %v546_v0 }
 0x12b   : > { %v642_v10 = vadd.f32 %v603_v35, %v542_v42  ;;  %v670_v20 = vsel %vm1480_vm4, %v646_v18, -1e+30 }
 0x12d   : > { %v666_v16 = vsel %vm1480_vm4, %v642_v10, -1e+30 }
 0x12f   : > { %v413_v13 = vpop.permute.xlu1 %412  ;;  %v513_v6 = vpop.permute.xlu2 %512 }
 0x130   : > { %v389_v56 = vpop.permute.xlu0 %388  ;;  %v447_v23 = vadd.f32 %v413_v13, %v1227_v37  ;;  %v711_v37 = vsel %vm674_vm6, %v666_v16, -inf }
 0x131   : > { %v435_v44 = vadd.f32 %v389_v56, %v1196_v24  ;;  %v658_v24 = vsel %vm1480_vm4, %v634_v5, -1e+30 }
 0x132   : > { %v675_v33 = vsel %vm674_vm6, %v658_v24, -inf }
 0x133   : > { %v535_v43 = vadd.f32 %v489_v61, %v435_v44 }
 0x137   : > { %v505_v19 = vpop.permute.xlu1 %504  ;;  %v605_v25 = vpop.permute.xlu2 %604 }
 0x138   : > { %v497_v52 = vpop.permute.xlu0 %496 }
 0x139   : > { %v539_v46 = vadd.f32 %v497_v52, %v439_v29  ;;  %v547_v52 = vadd.f32 %v513_v6, %v447_v23 }
 0x13b   : > { %v639_v26 = vadd.f32 %v597_v57, %v539_v46 }
 0x13d   : > { %v663_v48 = vsel %vm1484_vm5, %v639_v26, -1e+30 }
 0x13e   : > { %v694_v49 = vsel %vm674_vm6, %v663_v48, -inf }
 0x13f   : > { %v695_v1 = vmax.f32 %v693_v55, %v694_v49  ;;  %v1495_v2 = vpop.permute.xlu1 %390  ;;  %v1505_v61 = vpop.permute.xlu2 %500  ;;  %v1102_v49 = vmov 1  }
 0x140   : > { %v589_v3 = vpop.permute.xlu0 %588 }
 0x141   : > { %v696_v58 = vrot.slane %v695_v1, 4  ;;  %v635_v59 = vadd.f32 %v589_v3, %v535_v43 }
 0x143   : > { %v659_v9 = vsel %vm1484_vm5, %v635_v59, -1e+30  ;;  %v697_v11 = vmax.f32 %v695_v1, %v696_v58 }
 0x144   : > { %v676_v34 = vsel %vm674_vm6, %v659_v9, -inf }
 0x145   : > { %v677_v45 = vmax.f32 %v675_v33, %v676_v34  ;;  %v698_v57 = vrot.slane %v697_v11, 2 }
 0x147   : > { %v678_v62 = vrot.slane %v677_v45, 4  ;;  %v393_v56 = vpop.permute.xlu1 %392  ;;  %v699_v31 = vmax.f32 %v697_v11, %v698_v57  ;;  %v593_v17 = vpop.permute.xlu2 %592 }
 0x148   : > { %v405_v22 = vpop.permute.xlu0 %404  ;;  %v437_v32 = vadd.f32 %v393_v56, %v1255_v53  ;;  %v436_v53 = vadd.f32 %v1495_v2, %v1231_v40 }
 0x149   : > { %v679_v12 = vmax.f32 %v677_v45, %v678_v62  ;;  %v443_v28 = vadd.f32 %v405_v22, %v1225_v36  ;;  %v700_v14 = vrot.slane %v699_v31, 1 }
 0x14b   : > { %v543_v60 = vadd.f32 %v505_v19, %v443_v28  ;;  %v701_v39 = vmax.f32 %v699_v31, %v700_v14  ;;  %v680_v15 = vrot.slane %v679_v12, 2 }
 0x14d   : > { %v643_v29 = vadd.f32 %v605_v25, %v543_v60  ;;  %759 = vperm.xlu2 %1068, %v701_v39   ;;  %904 = vperm.xlu1 %1071, %v701_v39   ;;  %v681_v38 = vmax.f32 %v679_v12, %v680_v15  ;;  %v729_v25 = vsel %vm674_vm6, %v670_v20, -inf }
 0x14f   : > { %v667_v35 = vsel %vm1484_vm5, %v643_v29, -1e+30  ;;  %v401_v36 = vpop.permute.xlu1 %400  ;;  %v682_v30 = vrot.slane %v681_v38, 1  ;;  %v599_v4 = vpop.permute.xlu2 %598 }
 0x150   : > { %v712_v13 = vsel %vm674_vm6, %v667_v35, -inf  ;;  %v613_v19 = vpop.permute.xlu0 %612  ;;  %v441_v10 = vadd.f32 %v401_v36, %v1257_v54 }
 0x151   : > { %v713_v46 = vmax.f32 %v711_v37, %v712_v13  ;;  %v647_v44 = vadd.f32 %v613_v19, %v547_v52  ;;  %v683_v26 = vmax.f32 %v681_v38, %v682_v30 }
 0x152   : > { %v541_v23 = vadd.f32 %v1505_v61, %v441_v10 }
 0x153   : > { %v671_v6 = vsel %vm1484_vm5, %v647_v44, -1e+30  ;;  %749 = vperm.xlu0 %1067, %v683_v26   ;;  %v714_v5 = vrot.slane %v713_v46, 4 }
 0x154   : > { %v730_v48 = vsel %vm674_vm6, %v671_v6, -inf }
 0x155   : > { %v731_v55 = vmax.f32 %v729_v25, %v730_v48  ;;  %1070 = vset.pattern.permute.xlu2 %v1102_v49  ;;  %1074 = vset.pattern.permute.xlu1 %v1101_v63  ;;  %v715_v1 = vmax.f32 %v713_v46, %v714_v5 }
 0x156   : > { %839 = vperm.xlu2 %1070, %v701_v39  }
 0x157   : > { %v732_v43 = vrot.slane %v731_v55, 4  ;;  %v493_v3 = vpop.permute.xlu1 %492  ;;  %v716_v59 = vrot.slane %v715_v1, 2 }
 0x158   : > { %v399_v58 = vpop.permute.xlu0 %398  ;;  %v537_v57 = vadd.f32 %v493_v3, %v437_v32 }
 0x159   : > { %v733_v24 = vmax.f32 %v731_v55, %v732_v43  ;;  %v717_v33 = vmax.f32 %v715_v1, %v716_v59  ;;  %v440_v34 = vadd.f32 %v399_v58, %v1233_v41  ;;  %v409_v41 = vpop.permute.xlu2 %408 }
 0x15a   : > { %v637_v56 = vadd.f32 %v593_v17, %v537_v57 }
 0x15b   : > { %1069 = vset.pattern.permute.xlu0 %v1102_v49  ;;  %v734_v9 = vrot.slane %v733_v24, 2  ;;  %v718_v22 = vrot.slane %v717_v33, 1 }
 0x15c   : > { %831 = vperm.xlu0 %1069, %v683_v26   ;;  %v661_v54 = vsel %vm1484_vm5, %v637_v56, -1e+30 }
 0x15d   : > { %v735_v11 = vmax.f32 %v733_v24, %v734_v9  ;;  %v719_v14 = vmax.f32 %v717_v33, %v718_v22  ;;  %v685_v29 = vsel %vm674_vm6, %v661_v54, -inf  ;;  %v445_v9 = vadd.f32 %v409_v41, %v1290_v7 }
 0x15e   : > { %1072 = vset.pattern.permute.xlu2 %v1100_v47 }
 0x15f   : > { %896 = vperm.xlu2 %1072, %v683_v26   ;;  %v499_v42 = vpop.permute.xlu1 %498  ;;  %v736_v45 = vrot.slane %v735_v11, 1 }
 0x160   : > { %v491_v62 = vpop.permute.xlu0 %490  ;;  %v540_v31 = vadd.f32 %v499_v42, %v440_v34 }
 0x161   : > { %v1528_v0 = vmax.f32 %v735_v11, %v736_v45  ;;  %v536_v28 = vadd.f32 %v491_v62, %v436_v53  ;;  %v415_v37 = vpop.permute.xlu2 %414 }
 0x162   : > { %v640_v12 = vadd.f32 %v599_v4, %v540_v31  ;;  %v448_v42 = vadd.f32 %v415_v37, %v1252_v51 }
 0x163   : > { %779 = vperm.xlu1 %1074, %v1528_v0  }
 0x164   : > { %1080 = vset.pattern.permute.xlu0 %v1100_v47  ;;  %v664_v40 = vsel %vm1480_vm4, %v640_v12, -1e+30 }
 0x165   : > { %v702_v38 = vsel %vm674_vm6, %v664_v40, -inf }
 0x167   : > { %1073 = vset.pattern.permute.xlu2 %v1101_v63  ;;  %v591_v60 = vpop.permute.xlu1 %590 }
 0x168   : > { %769 = vperm.xlu2 %1073, %v719_v14   ;;  %v601_v39 = vpop.permute.xlu0 %600  ;;  %v636_v15 = vadd.f32 %v591_v60, %v536_v28 }
 0x169   : > { %v641_v2 = vadd.f32 %v601_v39, %v541_v23  ;;  %v507_v1 = vpop.permute.xlu2 %506 }
 0x16a   : > { %v660_v18 = vsel %vm1480_vm4, %v636_v15, -1e+30 }
 0x16b   : > { %v665_v16 = vsel %vm1484_vm5, %v641_v2, -1e+30  ;;  %v684_v61 = vsel %vm674_vm6, %v660_v18, -inf  ;;  %1076 = vset.pattern.permute.xlu1 %v1102_v49 }
 0x16c   : > { %v703_v52 = vsel %vm674_vm6, %v665_v16, -inf  ;;  %v686_v35 = vmax.f32 %v684_v61, %v685_v29  ;;  %855 = vperm.xlu1 %1076, %v1528_v0  }
 0x16d   : > { %v704_v36 = vmax.f32 %v702_v38, %v703_v52 }
 0x16e   : > { %v687_v30 = vrot.slane %v686_v35, 4 }
 0x16f   : > { %v705_v13 = vrot.slane %v704_v36, 4  ;;  %v407_v19 = vpop.permute.xlu1 %406 }
 0x170   : > { %v688_v46 = vmax.f32 %v686_v35, %v687_v30  ;;  %1075 = vset.pattern.permute.xlu2 %v1102_v49  ;;  %v417_v17 = vpop.permute.xlu0 %416  ;;  %v444_v33 = vadd.f32 %v407_v19, %v1250_v50 }
 0x171   : > { %v706_v20 = vmax.f32 %v704_v36, %v705_v13  ;;  %847 = vperm.xlu2 %1075, %v719_v14   ;;  %v449_v58 = vadd.f32 %v417_v17, %v1292_v8  ;;  %v617_v32 = vpop.permute.xlu2 %616 }
 0x172   : > { %v689_v44 = vrot.slane %v688_v46, 2  ;;  %v544_v62 = vadd.f32 %v507_v1, %v444_v33 }
 0x173   : > { %v707_v6 = vrot.slane %v706_v20, 2 }
 0x174   : > { %1078 = vset.pattern.permute.xlu1 %v1101_v63  ;;  %v690_v26 = vmax.f32 %v688_v46, %v689_v44 }
 0x175   : > { %v708_v43 = vmax.f32 %v706_v20, %v707_v6 }
 0x176   : > { %v691_v5 = vrot.slane %v690_v26, 1 }
 0x177   : > { %v517_v25 = vpop.permute.xlu1 %516  ;;  %v709_v3 = vrot.slane %v708_v43, 1 }
 0x178   : > { %v509_v48 = vpop.permute.xlu0 %508  ;;  %v692_v55 = vmax.f32 %v690_v26, %v691_v5  ;;  %v549_v59 = vadd.f32 %v517_v25, %v449_v58 }
 0x179   : > { %1077 = vset.pattern.permute.xlu2 %v1100_v47  ;;  %v710_v11 = vmax.f32 %v708_v43, %v709_v3  ;;  %v545_v34 = vadd.f32 %v509_v48, %v445_v9 }
 0x17a   : > { %912 = vperm.xlu2 %1077, %v719_v14   ;;  %900 = vperm.xlu0 %1080, %v692_v55   ;;  %v649_v45 = vadd.f32 %v617_v32, %v549_v59 }
 0x17b   : > { %754 = vperm.xlu1 %1078, %v692_v55  }
 0x17c   : > { %v673_v7 = vsel %vm1484_vm5, %v649_v45, -1e+30 }
 0x17d   : > { %v739_v56 = vsel %vm674_vm6, %v673_v7, -inf }
 0x17f   : > { %v609_v24 = vpop.permute.xlu1 %608 }
 0x180   : > { %v515_v4 = vpop.permute.xlu0 %514  ;;  %v645_v57 = vadd.f32 %v609_v24, %v545_v34 }
 0x181   : > { %v548_v8 = vadd.f32 %v515_v4, %v448_v42 }
 0x182   : > { %1083 = vset.pattern.permute.xlu2 %v1101_v63  ;;  %1082 = vset.pattern.permute.xlu0 %v1101_v63  ;;  %v669_v63 = vsel %vm1484_vm5, %v645_v57, -1e+30 }
 0x183   : > { %764 = vperm.xlu1 %1078, %v710_v11   ;;  %v721_v12 = vsel %vm674_vm6, %v669_v63, -inf }
 0x187   : > { %v615_v31 = vpop.permute.xlu1 %614 }
 0x188   : > { %v607_v22 = vpop.permute.xlu0 %606  ;;  %v648_v10 = vadd.f32 %v615_v31, %v548_v8 }
 0x189   : > { %v644_v53 = vadd.f32 %v607_v22, %v544_v62 }
 0x18a   : > { %v672_v50 = vsel %vm1480_vm4, %v648_v10, -1e+30 }
 0x18b   : > { %v668_v51 = vsel %vm1480_vm4, %v644_v53, -1e+30  ;;  %v738_v41 = vsel %vm674_vm6, %v672_v50, -inf  ;;  %1079 = vset.pattern.permute.xlu1 %v1102_v49 }
 0x18c   : > { %v720_v28 = vsel %vm674_vm6, %v668_v51, -inf  ;;  %v740_v14 = vmax.f32 %v738_v41, %v739_v56  ;;  %835 = vperm.xlu1 %1079, %v692_v55  }
 0x18d   : > { %v722_v21 = vmax.f32 %v720_v28, %v721_v12 }
 0x18e   : > { %v741_v23 = vrot.slane %v740_v14, 4 }
 0x18f   : > { %v723_v60 = vrot.slane %v722_v21, 4 }
 0x190   : > { %v742_v54 = vmax.f32 %v740_v14, %v741_v23 }
 0x191   : > { %v724_v39 = vmax.f32 %v722_v21, %v723_v60 }
 0x192   : > { %v743_v15 = vrot.slane %v742_v54, 2 }
 0x193   : > { %v725_v27 = vrot.slane %v724_v39, 2 }
 0x194   : > { %843 = vperm.xlu1 %1079, %v710_v11   ;;  %v744_v40 = vmax.f32 %v742_v54, %v743_v15 }
 0x195   : > { %v726_v2 = vmax.f32 %v724_v39, %v725_v27 }
 0x196   : > { %v745_v18 = vrot.slane %v744_v40, 1 }
 0x197   : > { %v727_v16 = vrot.slane %v726_v2, 1 }
 0x198   : > { %v746_v29 = vmax.f32 %v744_v40, %v745_v18 }
 0x199   : > { %v728_v61 = vmax.f32 %v726_v2, %v727_v16 }
 0x19a   : > { %784 = vperm.xlu2 %1083, %v746_v29  }
 0x19b   : > { %774 = vperm.xlu0 %1082, %v728_v61  }
 0x19c   : > { %1081 = vset.pattern.permute.xlu1 %v1100_v47 }
 0x19d   : > { %908 = vperm.xlu1 %1081, %v710_v11  }
 0x1a2   : > { %1085 = vset.pattern.permute.xlu2 %v1102_v49 }
 0x1a3   : > { %1084 = vset.pattern.permute.xlu0 %v1102_v49  ;;  %859 = vperm.xlu2 %1085, %v746_v29  }
 0x1a4   : > { %851 = vperm.xlu0 %1084, %v728_v61  }
 0x1a5   : > { %920 = vperm.xlu1 %1081, %v1528_v0  }
 0x1a7   : > { %v760_v38 = vpop.permute.xlu2 %759 }
 0x1ab   : > { %1087 = vset.pattern.permute.xlu2 %v1100_v47 }
 0x1ac   : > { %1086 = vset.pattern.permute.xlu0 %v1100_v47  ;;  %924 = vperm.xlu2 %1087, %v746_v29   ;;  %v202_v47 = vld [vmem:[%s1631_s2] sm:$0x7] }
 0x1ad   : > { %916 = vperm.xlu0 %1086, %v728_v61   ;;  %v787_v6 = vperm.slane %v202_v47, 0  ;;  %v862_v48 = vperm.slane %v202_v47, 1  ;;  %v1584_v32 = vperm.slane %v202_v47, 2  ;;  %v1088_v47 = vld [vmem:[%s1632_s3] ss:$0 sm:$0xff] }
 0x1af   : > { %v790_v24 = vmul.f32 %v787_v6, %v760_v38 }
 0x1b0   : > { %v840_v35 = vpop.permute.xlu2 %839 }
 0x1b1   : > { %v865_v11 = vmul.f32 %v862_v48, %v840_v35  ;;  %v810_v62 = vrot.slane %v790_v24, 6 }
 0x1b3   : > { %v881_v63 = vrot.slane %v865_v11, 6 }
 0x1b9   : > { %v897_v30 = vpop.permute.xlu2 %896 }
 0x1ba   : > { %v928_v18 = vmul.f32 %v1584_v32, %v897_v30 }
 0x1bf   : > { %v905_v52 = vpop.permute.xlu1 %904 }
 0x1c0   : > { %v930_v23 = vmul.f32 %v1584_v32, %v905_v52 }
 0x1c2   : > { %v770_v13 = vpop.permute.xlu2 %769  ;;  %v946_v35 = vrot.slane %v930_v23, 6 }
 0x1c3   : > { %v792_v33 = vmul.f32 %v787_v6, %v770_v13 }
 0x1c5   : > { %v750_v46 = vpop.permute.xlu0 %749  ;;  %v816_v51 = vrot.slane %v792_v33, 4 }
 0x1c6   : > { %v788_v59 = vmul.f32 %v787_v6, %v750_v46 }
 0x1cb   : > { %v848_v17 = vpop.permute.xlu2 %847 }
 0x1cc   : > { %v867_v53 = vmul.f32 %v862_v48, %v848_v17 }
 0x1ce   : > { %v832_v20 = vpop.permute.xlu0 %831  ;;  %v885_v15 = vrot.slane %v867_v53, 4 }
 0x1cf   : > { %v863_v34 = vmul.f32 %v862_v48, %v832_v20 }
 0x1d4   : > { %v1579_v0 = vpop.permute.xlu2 %912 }
 0x1d5   : > { %v780_v36 = vpop.permute.xlu1 %779  ;;  %v932_v30 = vmul.f32 %v1584_v32, %v1579_v0 }
 0x1d6   : > { %v794_v28 = vmul.f32 %v787_v6, %v780_v36 }
 0x1d8   : > { %v822_v61 = vrot.slane %v794_v28, 2 }
 0x1de   : > { %v856_v37 = vpop.permute.xlu1 %855 }
 0x1df   : > { %v869_v27 = vmul.f32 %v862_v48, %v856_v37 }
 0x1e1   : > { %v889_v46 = vrot.slane %v869_v27, 2 }
 0x1ec   : > { %v901_v26 = vpop.permute.xlu0 %900 }
 0x1ed   : > { %v755_v19 = vpop.permute.xlu1 %754  ;;  %v929_v7 = vmul.f32 %v1584_v32, %v901_v26 }
 0x1ee   : > { %v789_v55 = vmul.f32 %v787_v6, %v755_v19 }
 0x1ef   : > { %v944_v60 = vrot.slane %v929_v7, 7 }
 0x1f0   : > { %v807_v3 = vrot.slane %v789_v55, 7 }
 0x1f1   : > { %v945_v36 = vsel %vm808_vm7, %v944_v60, %v928_v18 }
 0x1f2   : > { %v809_v42 = vsel %vm808_vm7, %v807_v3, %v788_v59  ;;  %v947_v26 = vsel %vm811_vm8, %v946_v35, %v945_v36 }
 0x1f3   : > { %v812_v50 = vsel %vm811_vm8, %v810_v62, %v809_v42 }
 0x1f4   : > { %v785_v25 = vpop.permute.xlu2 %784 }
 0x1f5   : > { %v765_v49 = vpop.permute.xlu1 %764  ;;  %v795_v16 = vmul.f32 %v787_v6, %v785_v25 }
 0x1f6   : > { %v791_v58 = vmul.f32 %v787_v6, %v765_v49 }
 0x1f7   : > { %v825_v20 = vrot.slane %v795_v16, 1 }
 0x1f8   : > { %v813_v45 = vrot.slane %v791_v58, 5 }
 0x1fa   : > { %v815_v56 = vsel %vm814_vm9, %v813_v45, %v812_v50 }
 0x1fb   : > { %v818_v40 = vsel %vm817_vm10, %v816_v51, %v815_v56 }
 0x1fd   : > { %v860_v31 = vpop.permute.xlu2 %859 }
 0x1fe   : > { %v836_v44 = vpop.permute.xlu1 %835  ;;  %v870_v38 = vmul.f32 %v862_v48, %v860_v31 }
 0x1ff   : > { %v864_v1 = vmul.f32 %v862_v48, %v836_v44 }
 0x200   : > { %v891_v44 = vrot.slane %v870_v38, 1 }
 0x201   : > { %v879_v4 = vrot.slane %v864_v1, 7 }
 0x203   : > { %v880_v22 = vsel %vm808_vm7, %v879_v4, %v863_v34 }
 0x204   : > { %v882_v14 = vsel %vm811_vm8, %v881_v63, %v880_v22 }
 0x206   : > { %v844_v5 = vpop.permute.xlu1 %843  ;;  %v925_v49 = vpop.permute.xlu2 %924 }
 0x207   : > { %v866_v9 = vmul.f32 %v862_v48, %v844_v5  ;;  %v935_v25 = vmul.f32 %v1584_v32, %v925_v49 }
 0x209   : > { %v883_v10 = vrot.slane %v866_v9, 5  ;;  %v956_v9 = vrot.slane %v935_v25, 1 }
 0x20b   : > { %v884_v54 = vsel %vm814_vm9, %v883_v10, %v882_v14 }
 0x20c   : > { %v886_v52 = vsel %vm817_vm10, %v885_v15, %v884_v54 }
 0x20d   : > { %v775_v43 = vpop.permute.xlu0 %774 }
 0x20e   : > { %v793_v57 = vmul.f32 %v787_v6, %v775_v43  ;;  %v950_v43 = vrot.slane %v932_v30, 4 }
 0x20f   : > { %v909_v8 = vpop.permute.xlu1 %908 }
 0x210   : > { %v819_v41 = vrot.slane %v793_v57, 3  ;;  %v931_v39 = vmul.f32 %v1584_v32, %v909_v8 }
 0x212   : > { %v821_v29 = vsel %vm820_vm11, %v819_v41, %v818_v40  ;;  %v948_v37 = vrot.slane %v931_v39, 5 }
 0x213   : > { %v824_v17 = vsel %vm823_vm12, %v822_v61, %v821_v29 }
 0x214   : > { %v949_v55 = vsel %vm814_vm9, %v948_v37, %v947_v26 }
 0x215   : > { %v951_v4 = vsel %vm817_vm10, %v950_v43, %v949_v55 }
 0x216   : > { %v852_v12 = vpop.permute.xlu0 %851 }
 0x217   : > { %v868_v21 = vmul.f32 %v862_v48, %v852_v12  ;;  %v921_v19 = vpop.permute.xlu1 %920  ;;  %v827_v48 = vsel %vm826_vm13, %v825_v20, %v824_v17 }
 0x218   : > { %v934_v5 = vmul.f32 %v1584_v32, %v921_v19  ;;  %v829_v24 = vadd.f32 %v1088_v47, %v827_v48 }
 0x219   : > { %v887_v2 = vrot.slane %v868_v21, 3 }
 0x21a   : > { %v954_v59 = vrot.slane %v934_v5, 2 }
 0x21b   : > { %v888_v13 = vsel %vm820_vm11, %v887_v2, %v886_v52 }
 0x21c   : > { %v890_v6 = vsel %vm823_vm12, %v889_v46, %v888_v13 }
 0x21d   : > { %v892_v3 = vsel %vm826_vm13, %v891_v44, %v890_v6 }
 0x21e   : > { %v894_v33 = vadd.f32 %v892_v3, %v829_v24 }
 0x21f   : > { %v917_v0 = vpop.permute.xlu0 %916 }
 0x220   : > { %v933_v1 = vmul.f32 %v1584_v32, %v917_v0 }
 0x222   : > { %v952_v58 = vrot.slane %v933_v1, 3 }
 0x224   : > { %v953_v11 = vsel %vm820_vm11, %v952_v58, %v951_v4 }
 0x225   : > { %v955_v34 = vsel %vm823_vm12, %v954_v59, %v953_v11 }
 0x226   : > { %v957_v32 = vsel %vm826_vm13, %v956_v9, %v955_v34 }
 0x227   : > { %v959_v42 = vadd.f32 %v957_v32, %v894_v33 }
 0x229   : > { %961 = vst.msk [vmem:[%s197_s14] sm:$0xff] %vm960_vm14, %v959_v42 }
 0x22a PF: > { %s14_s15 = sadd.s32 1, %s1095_s15  }
 0x22b   : > { %p11_p5 = scmp.ge.s32.totalorder %s14_s15, 6  }
 0x22d   :  { %13 = sbr.rel (!%p11_p5) target bundleno = 1 (0x1), region = 66 }

</bundles_post_ra>
